<compile_context>
chip_gen: v7x
topology: tpu7x:2x2x1
jax: 0.10.0
libtpu: 0.0.40
codegen_flags: <defaults>
</compile_context>

<pallas_src>
import jax
import jax.numpy as jnp
from jax.experimental import pallas as pl
from jax.experimental.pallas import tpu as pltpu


_EPS = 1e-5
_TILE_K = 256      # Din reduction tile (multiple of 128 lanes)
_DOUT_PAD = 128    # pad logits to one full lane width


def _round_up(x, m):
    return (x + m - 1) // m * m


def esc_mlp_kernel(x_ref, g1_ref, b1_ref, w1_ref,           # streamed over Din
                   bias1_ref, g2_ref, b2_ref, mask_ref,      # resident
                   w2_ref, bias2_ref,                        # resident
                   out_ref, acc_ref):                        # out + scratch
    """Grid axis 0 tiles the flattened feature dim Din (reduction axis)."""
    k = pl.program_id(0)

    @pl.when(k == 0)
    def _init():
        acc_ref[...] = jnp.zeros_like(acc_ref)

    # ---- BatchNorm1d #1 (training: per-feature batch stats, biased var) ----
    # One-pass stats: var = E[x^2] - mean^2.  Stats are along axis 0, so they
    # are local to this Din tile.
    x = x_ref[...]                                            # (B, TK) f32
    mean1 = jnp.mean(x, axis=0, keepdims=True)
    var1 = jnp.mean(x * x, axis=0, keepdims=True) - mean1 * mean1
    xn = (x - mean1) * jax.lax.rsqrt(var1 + _EPS) * g1_ref[...] + b1_ref[...]

    # ---- hidden Linear: stream w1 tiles, accumulate in f32 on the MXU ----
    acc_ref[...] += jnp.dot(xn.astype(jnp.bfloat16), w1_ref[...],
                            preferred_element_type=jnp.float32)

    # ---- finalize: bias + ReLU + BN2 + dropout + output Linear ----
    @pl.when(k == pl.num_programs(0) - 1)
    def _finalize():
        h = jnp.maximum(acc_ref[...] + bias1_ref[...], 0.0)   # (B, H)
        mean2 = jnp.mean(h, axis=0, keepdims=True)
        var2 = jnp.mean(h * h, axis=0, keepdims=True) - mean2 * mean2
        # g2/b2 arrive pre-scaled by the inverted-dropout factor 1/(1-p) = 2,
        # so the per-element dropout path is a pure select.
        hn = (h - mean2) * jax.lax.rsqrt(var2 + _EPS) * g2_ref[...] + b2_ref[...]
        hd = jnp.where(mask_ref[...] != 0.0, hn, 0.0)
        out_ref[...] = (jnp.dot(hd.astype(jnp.bfloat16), w2_ref[...],
                                preferred_element_type=jnp.float32)
                        + bias2_ref[...])


@jax.jit
def esc_model_forward(x_nchw, params, key):
    """x_nchw: (B, C, H, W) float32. key: PRNG key for dropout.
    Returns logits (B, out_channels)."""
    B = x_nchw.shape[0]
    x_flat = x_nchw.reshape(B, -1).astype(jnp.float32)        # nn.Flatten()
    din = x_flat.shape[1]
    hidden = params["w1"].shape[1]
    dout = params["w2"].shape[1]

    din_pad = _round_up(din, _TILE_K)
    n_k = din_pad // _TILE_K

    def pad_last(a, target):
        return jnp.pad(a, [(0, 0)] * (a.ndim - 1) + [(0, target - a.shape[-1])])

    # Zero-padded feature columns normalize to exactly 0 (beta padded with 0)
    # and hit zero rows of w1, so they contribute nothing to the matmul.
    x_p = pad_last(x_flat, din_pad)
    g1 = pad_last(params["bn1_gamma"], din_pad)
    b1 = pad_last(params["bn1_beta"], din_pad)
    w1 = jnp.pad(params["w1"], ((0, din_pad - din), (0, 0))).astype(jnp.bfloat16)
    bias1 = params["b1"]
    # Fold inverted-dropout scale (1/(1-0.5) = 2) into the BN2 affine vectors.
    g2 = params["bn2_gamma"] * 2.0
    b2 = params["bn2_beta"] * 2.0
    # Lane-dense (128-wide) output path: pad w2/b2, slice logits afterwards.
    w2 = pad_last(params["w2"], _DOUT_PAD).astype(jnp.bfloat16)
    bias2 = pad_last(params["b2"], _DOUT_PAD)

    # Dropout keep mask (p = 0.5); vary `key` per training step outside.
    mask = jax.random.bernoulli(key, 0.5, (B, hidden)).astype(jnp.float32)

    # Explicit VMEM budget (double-buffered streaming tiles + resident
    # finalize operands) — keeps the same tiling valid on v7x's 64 MiB VMEM.
    tile_bytes = (2 * B * _TILE_K * 4            # x tiles (f32, 2 buffers)
                  + 2 * _TILE_K * hidden * 2     # w1 tiles (bf16, 2 buffers)
                  + 2 * 2 * _TILE_K * 4          # gamma1/beta1 tiles
                  + B * hidden * 4               # acc scratch
                  + (3 * hidden + B * hidden) * 4
                  + hidden * _DOUT_PAD * 2 + _DOUT_PAD * 4
                  + B * _DOUT_PAD * 4)
    vmem_limit = int(min(max(2 * tile_bytes, 4 << 20), 48 << 20))

    const = lambda k: (0, 0)
    out_padded = pl.pallas_call(
        esc_mlp_kernel,
        out_shape=jax.ShapeDtypeStruct((B, _DOUT_PAD), jnp.float32),
        grid=(n_k,),
        in_specs=[
            pl.BlockSpec((B, _TILE_K), lambda k: (0, k)),        # x
            pl.BlockSpec((1, _TILE_K), lambda k: (0, k)),        # bn1 gamma
            pl.BlockSpec((1, _TILE_K), lambda k: (0, k)),        # bn1 beta
            pl.BlockSpec((_TILE_K, hidden), lambda k: (k, 0)),   # w1 (streamed)
            pl.BlockSpec((1, hidden), const),                    # b1
            pl.BlockSpec((1, hidden), const),                    # bn2 gamma*2
            pl.BlockSpec((1, hidden), const),                    # bn2 beta*2
            pl.BlockSpec((B, hidden), const),                    # dropout mask
            pl.BlockSpec((hidden, _DOUT_PAD), const),            # w2 (padded)
            pl.BlockSpec((1, _DOUT_PAD), const),                 # b2 (padded)
        ],
        out_specs=pl.BlockSpec((B, _DOUT_PAD), const),
        scratch_shapes=[pltpu.VMEM((B, hidden), jnp.float32)],   # h accumulator
        compiler_params=pltpu.CompilerParams(
            dimension_semantics=("arbitrary",),
            vmem_limit_bytes=vmem_limit),
    )(x_p, g1, b1, w1, bias1, g2, b2, mask, w2, bias2)

    return out_padded[:, :dout]


def init_params(key, in_channels, hidden_dim, out_channels):
    k1, k2, k3, k4 = jax.random.split(key, 4)
    # PyTorch Linear default init: U(-1/sqrt(fan_in), 1/sqrt(fan_in))
    lim1 = 1.0 / jnp.sqrt(in_channels)
    lim2 = 1.0 / jnp.sqrt(hidden_dim)
    return {
        "bn1_gamma": jnp.ones((1, in_channels), jnp.float32),
        "bn1_beta": jnp.zeros((1, in_channels), jnp.float32),
        "w1": jax.random.uniform(k1, (in_channels, hidden_dim),
                                 jnp.float32, -lim1, lim1),
        "b1": jax.random.uniform(k2, (1, hidden_dim),
                                 jnp.float32, -lim1, lim1),
        "bn2_gamma": jnp.ones((1, hidden_dim), jnp.float32),
        "bn2_beta": jnp.zeros((1, hidden_dim), jnp.float32),
        "w2": jax.random.uniform(k3, (hidden_dim, out_channels),
                                 jnp.float32, -lim2, lim2),
        "b2": jax.random.uniform(k4, (1, out_channels),
                                 jnp.float32, -lim2, lim2),
    }


if __name__ == "__main__":
    key = jax.random.PRNGKey(0)
    kx, kp, kd = jax.random.split(key, 3)

    # Small shapes: base_model output treated as (B, C, H, W) = (8, 4, 16, 16)
    # -> flattened feature dim in_channels = 4*16*16 = 1024
    B, C, H, W = 8, 4, 16, 16
    in_channels = C * H * W        # 1024
    hidden_dim = 128
    out_channels = 10

    x = jax.random.normal(kx, (B, C, H, W), jnp.float32)
    params = init_params(kp, in_channels, hidden_dim, out_channels)

    logits = esc_model_forward(x, params, kd)
    jax.block_until_ready(logits)

    assert logits.shape == (B, out_channels)
    assert logits.dtype == jnp.float32
    assert bool(jnp.all(jnp.isfinite(logits)))
    print("KERNEL_OK")
</pallas_src>

<mosaic_0001>
module attributes {stable_mosaic.version = 11 : i64} {
  func.func @esc_mlp_kernel(%arg0: i32, %arg1: memref<8x256xf32, #tpu.memory_space<vmem>>, %arg2: memref<1x256xf32, #tpu.memory_space<vmem>>, %arg3: memref<1x256xf32, #tpu.memory_space<vmem>>, %arg4: memref<256x128xbf16, #tpu.memory_space<vmem>>, %arg5: memref<1x128xf32, #tpu.memory_space<vmem>>, %arg6: memref<1x128xf32, #tpu.memory_space<vmem>>, %arg7: memref<1x128xf32, #tpu.memory_space<vmem>>, %arg8: memref<8x128xf32, #tpu.memory_space<vmem>>, %arg9: memref<128x128xbf16, #tpu.memory_space<vmem>>, %arg10: memref<1x128xf32, #tpu.memory_space<vmem>>, %arg11: memref<8x128xf32, #tpu.memory_space<vmem>>, %arg12: memref<8x128xf32, #tpu.memory_space<vmem>>) attributes {dimension_semantics = [#tpu.dimension_semantics<arbitrary>], iteration_bounds = array<i64: 4>, scalar_prefetch = 0 : i64, scratch_operands = 1 : i64, tpu.core_type = #tpu.core_type<tc>, window_params = [{transform_indices = @transform_0, window_bounds = array<i64: 8, 256>}, {transform_indices = @transform_1, window_bounds = array<i64: 1, 256>}, {transform_indices = @transform_2, window_bounds = array<i64: 1, 256>}, {transform_indices = @transform_3, window_bounds = array<i64: 256, 128>}, {pipeline_mode = #tpu.pipeline_mode<synchronous>, transform_indices = @transform_4, window_bounds = array<i64: 1, 128>}, {pipeline_mode = #tpu.pipeline_mode<synchronous>, transform_indices = @transform_5, window_bounds = array<i64: 1, 128>}, {pipeline_mode = #tpu.pipeline_mode<synchronous>, transform_indices = @transform_6, window_bounds = array<i64: 1, 128>}, {pipeline_mode = #tpu.pipeline_mode<synchronous>, transform_indices = @transform_7, window_bounds = array<i64: 8, 128>}, {pipeline_mode = #tpu.pipeline_mode<synchronous>, transform_indices = @transform_8, window_bounds = array<i64: 128, 128>}, {pipeline_mode = #tpu.pipeline_mode<synchronous>, transform_indices = @transform_9, window_bounds = array<i64: 1, 128>}, {pipeline_mode = #tpu.pipeline_mode<synchronous>, transform_indices = @transform_10, window_bounds = array<i64: 8, 128>}]} {
    %c0_i32 = arith.constant 0 : i32
    %0 = arith.cmpi eq, %arg0, %c0_i32 : i32
    %1 = arith.extui %0 : i1 to i32
    %c0_i32_0 = arith.constant 0 : i32
    %2 = arith.cmpi ne, %1, %c0_i32_0 : i32
    scf.if %2 {
      %cst_18 = arith.constant 0.000000e+00 : f32
      %37 = vector.broadcast %cst_18 : f32 to vector<8x128xf32>
      %c0_19 = arith.constant 0 : index
      %c0_20 = arith.constant 0 : index
      %38 = vector.load %arg12[%c0_19, %c0_20] : memref<8x128xf32, #tpu.memory_space<vmem>>, vector<8x128xf32>
      tpu.vector_store %arg12[%c0_19, %c0_20], %37 {strides = array<i32>} : memref<8x128xf32, #tpu.memory_space<vmem>>, vector<8x128xf32>,
    } else {
    }
    %c0 = arith.constant 0 : index
    %c0_1 = arith.constant 0 : index
    %3 = vector.load %arg1[%c0, %c0_1] : memref<8x256xf32, #tpu.memory_space<vmem>>, vector<8x256xf32>
    %cst = arith.constant dense<0.000000e+00> : vector<256xf32>
    %4 = vector.multi_reduction <add>, %3, %cst [0] : vector<8x256xf32> to vector<256xf32>
    %5 = vector.shape_cast %4 : vector<256xf32> to vector<1x256xf32>
    %cst_2 = arith.constant 8.000000e+00 : f32
    %6 = vector.broadcast %cst_2 : f32 to vector<1x256xf32>
    %7 = arith.divf %5, %6 : vector<1x256xf32>
    %8 = arith.mulf %3, %3 : vector<8x256xf32>
    %cst_3 = arith.constant dense<0.000000e+00> : vector<256xf32>
    %9 = vector.multi_reduction <add>, %8, %cst_3 [0] : vector<8x256xf32> to vector<256xf32>
    %10 = vector.shape_cast %9 : vector<256xf32> to vector<1x256xf32>
    %cst_4 = arith.constant 8.000000e+00 : f32
    %11 = vector.broadcast %cst_4 : f32 to vector<1x256xf32>
    %12 = arith.divf %10, %11 : vector<1x256xf32>
    %13 = arith.mulf %7, %7 : vector<1x256xf32>
    %14 = arith.subf %12, %13 : vector<1x256xf32>
    %15 = vector.broadcast %7 : vector<1x256xf32> to vector<8x256xf32>
    %16 = arith.subf %3, %15 : vector<8x256xf32>
    %cst_5 = arith.constant 9.99999974E-6 : f32
    %17 = vector.broadcast %cst_5 : f32 to vector<1x256xf32>
    %18 = arith.addf %14, %17 : vector<1x256xf32>
    %19 = math.rsqrt %18 : vector<1x256xf32>
    %20 = vector.broadcast %19 : vector<1x256xf32> to vector<8x256xf32>
    %21 = arith.mulf %16, %20 : vector<8x256xf32>
    %c0_6 = arith.constant 0 : index
    %c0_7 = arith.constant 0 : index
    %22 = vector.load %arg2[%c0_6, %c0_7] : memref<1x256xf32, #tpu.memory_space<vmem>>, vector<1x256xf32>
    %23 = vector.broadcast %22 : vector<1x256xf32> to vector<8x256xf32>
    %24 = arith.mulf %21, %23 : vector<8x256xf32>
    %c0_8 = arith.constant 0 : index
    %c0_9 = arith.constant 0 : index
    %25 = vector.load %arg3[%c0_8, %c0_9] : memref<1x256xf32, #tpu.memory_space<vmem>>, vector<1x256xf32>
    %26 = vector.broadcast %25 : vector<1x256xf32> to vector<8x256xf32>
    %27 = arith.addf %24, %26 : vector<8x256xf32>
    %c0_10 = arith.constant 0 : index
    %c0_11 = arith.constant 0 : index
    %28 = vector.load %arg12[%c0_10, %c0_11] : memref<8x128xf32, #tpu.memory_space<vmem>>, vector<8x128xf32>
    %29 = arith.truncf %27 : vector<8x256xf32> to vector<8x256xbf16>
    %c0_12 = arith.constant 0 : index
    %c0_13 = arith.constant 0 : index
    %30 = vector.load %arg4[%c0_12, %c0_13] : memref<256x128xbf16, #tpu.memory_space<vmem>>, vector<256x128xbf16>
    %cst_14 = arith.constant dense<0.000000e+00> : vector<8x128xf32>
    %31 = tpu.matmul %29, %30, %cst_14 {dimension_numbers = #tpu.dot_dimension_numbers<[1], [0], [0], [1], [0, 0, 1, 1], [], []>} : vector<8x256xbf16>, vector<256x128xbf16>, vector<8x128xf32> -> vector<8x128xf32>
    %32 = arith.addf %28, %31 : vector<8x128xf32>
    %c0_15 = arith.constant 0 : index
    %c0_16 = arith.constant 0 : index
    %33 = vector.load %arg12[%c0_15, %c0_16] : memref<8x128xf32, #tpu.memory_space<vmem>>, vector<8x128xf32>
    tpu.vector_store %arg12[%c0_15, %c0_16], %32 {strides = array<i32>} : memref<8x128xf32, #tpu.memory_space<vmem>>, vector<8x128xf32>,
    %c3_i32 = arith.constant 3 : i32
    %34 = arith.cmpi eq, %arg0, %c3_i32 : i32
    %35 = arith.extui %34 : i1 to i32
    %c0_i32_17 = arith.constant 0 : i32
    %36 = arith.cmpi ne, %35, %c0_i32_17 : i32
    scf.if %36 {
      %c0_18 = arith.constant 0 : index
      %c0_19 = arith.constant 0 : index
      %37 = vector.load %arg12[%c0_18, %c0_19] : memref<8x128xf32, #tpu.memory_space<vmem>>, vector<8x128xf32>
      %c0_20 = arith.constant 0 : index
      %c0_21 = arith.constant 0 : index
      %38 = vector.load %arg5[%c0_20, %c0_21] : memref<1x128xf32, #tpu.memory_space<vmem>>, vector<1x128xf32>
      %39 = vector.broadcast %38 : vector<1x128xf32> to vector<8x128xf32>
      %40 = arith.addf %37, %39 : vector<8x128xf32>
      %cst_22 = arith.constant 0.000000e+00 : f32
      %41 = vector.broadcast %cst_22 : f32 to vector<8x128xf32>
      %42 = arith.maximumf %40, %41 : vector<8x128xf32>
      %cst_23 = arith.constant dense<0.000000e+00> : vector<128xf32>
      %43 = vector.multi_reduction <add>, %42, %cst_23 [0] : vector<8x128xf32> to vector<128xf32>
      %44 = vector.shape_cast %43 : vector<128xf32> to vector<1x128xf32>
      %cst_24 = arith.constant 8.000000e+00 : f32
      %45 = vector.broadcast %cst_24 : f32 to vector<1x128xf32>
      %46 = arith.divf %44, %45 : vector<1x128xf32>
      %47 = arith.mulf %42, %42 : vector<8x128xf32>
      %cst_25 = arith.constant dense<0.000000e+00> : vector<128xf32>
      %48 = vector.multi_reduction <add>, %47, %cst_25 [0] : vector<8x128xf32> to vector<128xf32>
      %49 = vector.shape_cast %48 : vector<128xf32> to vector<1x128xf32>
      %cst_26 = arith.constant 8.000000e+00 : f32
      %50 = vector.broadcast %cst_26 : f32 to vector<1x128xf32>
      %51 = arith.divf %49, %50 : vector<1x128xf32>
      %52 = arith.mulf %46, %46 : vector<1x128xf32>
      %53 = arith.subf %51, %52 : vector<1x128xf32>
      %54 = vector.broadcast %46 : vector<1x128xf32> to vector<8x128xf32>
      %55 = arith.subf %42, %54 : vector<8x128xf32>
      %cst_27 = arith.constant 9.99999974E-6 : f32
      %56 = vector.broadcast %cst_27 : f32 to vector<1x128xf32>
      %57 = arith.addf %53, %56 : vector<1x128xf32>
      %58 = math.rsqrt %57 : vector<1x128xf32>
      %59 = vector.broadcast %58 : vector<1x128xf32> to vector<8x128xf32>
      %60 = arith.mulf %55, %59 : vector<8x128xf32>
      %c0_28 = arith.constant 0 : index
      %c0_29 = arith.constant 0 : index
      %61 = vector.load %arg6[%c0_28, %c0_29] : memref<1x128xf32, #tpu.memory_space<vmem>>, vector<1x128xf32>
      %62 = vector.broadcast %61 : vector<1x128xf32> to vector<8x128xf32>
      %63 = arith.mulf %60, %62 : vector<8x128xf32>
      %c0_30 = arith.constant 0 : index
      %c0_31 = arith.constant 0 : index
      %64 = vector.load %arg7[%c0_30, %c0_31] : memref<1x128xf32, #tpu.memory_space<vmem>>, vector<1x128xf32>
      %65 = vector.broadcast %64 : vector<1x128xf32> to vector<8x128xf32>
      %66 = arith.addf %63, %65 : vector<8x128xf32>
      %c0_32 = arith.constant 0 : index
      %c0_33 = arith.constant 0 : index
      %67 = vector.load %arg8[%c0_32, %c0_33] : memref<8x128xf32, #tpu.memory_space<vmem>>, vector<8x128xf32>
      %cst_34 = arith.constant 0.000000e+00 : f32
      %68 = vector.broadcast %cst_34 : f32 to vector<8x128xf32>
      %69 = arith.cmpf one, %67, %68 : vector<8x128xf32>
      %cst_35 = arith.constant 0.000000e+00 : f32
      %70 = vector.broadcast %cst_35 : f32 to vector<8x128xf32>
      %71 = arith.select %69, %66, %70 : vector<8x128xi1>, vector<8x128xf32>
      %72 = arith.truncf %71 : vector<8x128xf32> to vector<8x128xbf16>
      %c0_36 = arith.constant 0 : index
      %c0_37 = arith.constant 0 : index
      %73 = vector.load %arg9[%c0_36, %c0_37] : memref<128x128xbf16, #tpu.memory_space<vmem>>, vector<128x128xbf16>
      %cst_38 = arith.constant dense<0.000000e+00> : vector<8x128xf32>
      %74 = tpu.matmul %72, %73, %cst_38 {dimension_numbers = #tpu.dot_dimension_numbers<[1], [0], [0], [1], [0, 0, 1, 1], [], []>} : vector<8x128xbf16>, vector<128x128xbf16>, vector<8x128xf32> -> vector<8x128xf32>
      %c0_39 = arith.constant 0 : index
      %c0_40 = arith.constant 0 : index
      %75 = vector.load %arg10[%c0_39, %c0_40] : memref<1x128xf32, #tpu.memory_space<vmem>>, vector<1x128xf32>
      %76 = vector.broadcast %75 : vector<1x128xf32> to vector<8x128xf32>
      %77 = arith.addf %74, %76 : vector<8x128xf32>
      %c0_41 = arith.constant 0 : index
      %c0_42 = arith.constant 0 : index
      %78 = vector.load %arg11[%c0_41, %c0_42] : memref<8x128xf32, #tpu.memory_space<vmem>>, vector<8x128xf32>
      tpu.vector_store %arg11[%c0_41, %c0_42], %77 {strides = array<i32>} : memref<8x128xf32, #tpu.memory_space<vmem>>, vector<8x128xf32>,
    } else {
    }
    return
  }
  func.func @transform_0(%arg0: i32) -> (i32, i32) {
    %c0_i32 = arith.constant 0 : i32
    %c0_i32_0 = arith.constant 0 : i32
    return %c0_i32, %arg0 : i32, i32
  }
  func.func @transform_1(%arg0: i32) -> (i32, i32) {
    %c0_i32 = arith.constant 0 : i32
    %c0_i32_0 = arith.constant 0 : i32
    return %c0_i32, %arg0 : i32, i32
  }
  func.func @transform_2(%arg0: i32) -> (i32, i32) {
    %c0_i32 = arith.constant 0 : i32
    %c0_i32_0 = arith.constant 0 : i32
    return %c0_i32, %arg0 : i32, i32
  }
  func.func @transform_3(%arg0: i32) -> (i32, i32) {
    %c0_i32 = arith.constant 0 : i32
    %c0_i32_0 = arith.constant 0 : i32
    return %arg0, %c0_i32 : i32, i32
  }
  func.func @transform_4(%arg0: i32) -> (i32, i32) {
    %c0_i32 = arith.constant 0 : i32
    %c0_i32_0 = arith.constant 0 : i32
    %c0_i32_1 = arith.constant 0 : i32
    return %c0_i32, %c0_i32_0 : i32, i32
  }
  func.func @transform_5(%arg0: i32) -> (i32, i32) {
    %c0_i32 = arith.constant 0 : i32
    %c0_i32_0 = arith.constant 0 : i32
    %c0_i32_1 = arith.constant 0 : i32
    return %c0_i32, %c0_i32_0 : i32, i32
  }
  func.func @transform_6(%arg0: i32) -> (i32, i32) {
    %c0_i32 = arith.constant 0 : i32
    %c0_i32_0 = arith.constant 0 : i32
    %c0_i32_1 = arith.constant 0 : i32
    return %c0_i32, %c0_i32_0 : i32, i32
  }
  func.func @transform_7(%arg0: i32) -> (i32, i32) {
    %c0_i32 = arith.constant 0 : i32
    %c0_i32_0 = arith.constant 0 : i32
    %c0_i32_1 = arith.constant 0 : i32
    return %c0_i32, %c0_i32_0 : i32, i32
  }
  func.func @transform_8(%arg0: i32) -> (i32, i32) {
    %c0_i32 = arith.constant 0 : i32
    %c0_i32_0 = arith.constant 0 : i32
    %c0_i32_1 = arith.constant 0 : i32
    return %c0_i32, %c0_i32_0 : i32, i32
  }
  func.func @transform_9(%arg0: i32) -> (i32, i32) {
    %c0_i32 = arith.constant 0 : i32
    %c0_i32_0 = arith.constant 0 : i32
    %c0_i32_1 = arith.constant 0 : i32
    return %c0_i32, %c0_i32_0 : i32, i32
  }
  func.func @transform_10(%arg0: i32) -> (i32, i32) {
    %c0_i32 = arith.constant 0 : i32
    %c0_i32_0 = arith.constant 0 : i32
    %c0_i32_1 = arith.constant 0 : i32
    return %c0_i32, %c0_i32_0 : i32, i32
  }
}

</mosaic_0001>

<bundles_post_ra>
// kernel: esc_model_forward.1
= control target key start
LH: loop header
LB: loop body
LE: loop exit
PB: predicated region body
PF: predicated region fallthrough
CT: control target
= control target key end

     0   :  { %15 = vsyncpa [#allocation4], 0  ;;  %s1146_s13 = smov 0   ;;  %s1288_s0 = inlined_call_operand.vmem [shape: f32[8,1024], index: 0, kind: input, shape index: {}]   ;;  %s1289_s1 = inlined_call_operand.vmem [shape: f32[1,1024], index: 1, kind: input, shape index: {}]   ;;  %s1290_s2 = inlined_call_operand.vmem [shape: f32[1,1024], index: 2, kind: input, shape index: {}]   ;;  %s1291_s3 = inlined_call_operand.vmem [shape: bf16[1024,128], index: 3, kind: input, shape index: {}]   ;;  %s1292_s4 = inlined_call_operand.vmem [shape: f32[1,128], index: 4, kind: input, shape index: {}]   ;;  %s1293_s5 = inlined_call_operand.vmem [shape: f32[1,128], index: 5, kind: input, shape index: {}]   ;;  %s1294_s6 = inlined_call_operand.vmem [shape: f32[1,128], index: 6, kind: input, shape index: {}]   ;;  %s1295_s7 = inlined_call_operand.vmem [shape: f32[8,128], index: 7, kind: input, shape index: {}]   ;;  %s1296_s8 = inlined_call_operand.vmem [shape: bf16[128,128], index: 8, kind: input, shape index: {}]   ;;  %s1297_s9 = inlined_call_operand.vmem [shape: f32[1,128], index: 9, kind: input, shape index: {}]   ;;  %s1298_s10 = inlined_call_operand.hbm [shape: f32[8,128], index: 10, kind: output, shape index: {}]  }
   0x1 LB: > { %s1152_s14 = sadd.s32 4294967295, %s1085_s13   ;;  %p906_p0 = scmp.ge.s32.totalorder %s1085_s13, 1  ;;  %s1085_s13 = sphi %s1146_s13, %s21_s13  }
   0x2   : > { %p340_p1 = scmp.lt.s32.totalorder %s1085_s13, 5 }
   0x4   : > { %p341_p2 = pnand %p906_p0, %p340_p1 }
   0x5   : > { %s907_s15 = sshll.u32 (!%p341_p2), %s1152_s14, 1  ;;  %s911_s16 = sshll.u32 (!%p341_p2), %s1152_s14, 5 }
   0x6   : > { %344 = sbr.rel (%p341_p2) target bundleno = 575 (0x23f), region = 60  ;;  %p387_p3 = scmp.lt.s32.totalorder (!%p341_p2), %s907_s15, 7 }
   0x7   : > { %p403_p4 = scmp.lt.s32.totalorder (!%p341_p2), %s911_s16, 127  ;;  %p913_p5 = scmp.ne.s32.totalorder (!%p341_p2), %s1152_s14, 0 }
   0xd   : > { %s1300_s15 = smov (!%p387_p3, %s907_s15), 7  ;;  %s1302_s16 = smov (!%p403_p4, %s911_s16), 127 }
   0xe   : > { %s908_s17 = sshll.u32 %s1300_s15, 3  ;;  %s395_s20 = scalar_lea.vmem %s1289_s1, %s1300_s15  ;;  %v1087_v0 = vmov (!%p913_p5), 0.0  }
   0xf   : > { %s1168_s23 = scalar_lea.vmem %s1288_s0, %s908_s17  ;;  %s400_s26 = scalar_lea.vmem %s1290_s2, %s1300_s15  ;;  %413 = vst [vmem:[#allocation2] sm:$0xff] (!%p913_p5), %v1087_v0 }
  0x10   : > { %s912_s27 = sshll.u32 %s1302_s16, 2  ;;  %412 = sbr.rel (%p913_p5) target bundleno = 23 (0x17), region = 64 }
  0x11   : > { %s1177_s30 = scalar_lea.vmem %s1291_s3, %s912_s27 }
  0x17 PF: > { %v1019_v1 = vld [vmem:[%s1177_s30 + $0x40] sm:$0xff]   ;;  %v1021_v3 = vld [vmem:[%s1177_s30 + $0x48] sm:$0xff]   ;;  %v1023_v5 = vld [vmem:[%s1177_s30 + $0x50] sm:$0xff]   ;;  %v461_v52 = vlaneseq  ;;  %p930_p6 = scmp.ne.s32.totalorder %s1152_s14, 3 }
  0x18   : > { %v1020_v2 = vld [vmem:[%s1177_s30] sm:$0xff]   ;;  %950 = vmatprep.subr.bf16.mxu0 %v1019_v1  ;;  %v1022_v4 = vld [vmem:[%s1177_s30 + $0x8] sm:$0xff]   ;;  %v1024_v6 = vld [vmem:[%s1177_s30 + $0x10] sm:$0xff]   ;;  %vm1089_vm0 = vmmov (!%p930_p6), 0  }
  0x19   : > { %951 = vmatpush3.bf16.msra.mxu0 %v1020_v2  ;;  %v1025_v7 = vld [vmem:[%s1177_s30 + $0x58] sm:$0xff]   ;;  %v1027_v9 = vld [vmem:[%s1177_s30 + $0x60] sm:$0xff]   ;;  %v1029_v11 = vld [vmem:[%s1177_s30 + $0x68] sm:$0xff]   ;;  %v462_v56 = vshrl.u32 %v461_v52, 7 }
  0x1a   : > { %952 = vmatprep.subr.bf16.mxu0 %v1021_v3  ;;  %v1026_v8 = vld [vmem:[%s1177_s30 + $0x18] sm:$0xff]   ;;  %v1028_v10 = vld [vmem:[%s1177_s30 + $0x20] sm:$0xff]   ;;  %v1192_v12 = vld [vmem:[%s1168_s23 + $0x8] sm:$0xff] }
  0x1b   : > { %v422_v13 = vrot.slane %v1192_v12, 4  ;;  %v432_v14 = vmul.f32 %v1192_v12, %v1192_v12  ;;  %v1198_v15 = vld [vmem:[%s1168_s23] sm:$0xff]  ;;  %v1030_v18 = vld [vmem:[%s1177_s30 + $0x28] sm:$0xff]   ;;  %v1031_v21 = vld [vmem:[%s1177_s30 + $0x70] sm:$0xff]   ;;  %v467_v57 = vsub.s32 1, %v462_v56  ;;  %v463_v59 = vsub.s32 0, %v462_v56 }
  0x1c   : > { %v416_v16 = vrot.slane %v1198_v15, 4  ;;  %v431_v17 = vmul.f32 %v1198_v15, %v1198_v15  ;;  %v1032_v28 = vld [vmem:[%s1177_s30 + $0x30] sm:$0xff]   ;;  %v1033_v31 = vld [vmem:[%s1177_s30 + $0x78] sm:$0xff]   ;;  %v459_v58 = vld [vmem:[%s395_s20] sm:$0x3] }
  0x1d   : > { %953 = vmatpush3.bf16.msra.mxu0 %v1022_v4  ;;  %v423_v19 = vadd.f32 %v422_v13, %v1192_v12  ;;  %v439_v20 = vrot.slane %v432_v14, 4  ;;  %v1034_v38 = vld [vmem:[%s1177_s30 + $0x38] sm:$0xff]   ;;  %v473_v61 = vld [vmem:[%s400_s26] sm:$0x3]  ;;  %v468_v63 = vrot.slane %v459_v58, %v467_v57  ;;  %v464_v1 = vrot.slane %v459_v58, %v463_v59 }
  0x1e   : > { %954 = vmatprep.subr.bf16.mxu0 %v1023_v5  ;;  %v417_v22 = vadd.f32 %v416_v16, %v1198_v15  ;;  %v433_v23 = vrot.slane %v431_v17, 4  ;;  %v482_v4 = vrot.slane %v473_v61, %v467_v57  ;;  %v478_v5 = vrot.slane %v473_v61, %v463_v59  ;;  %v933_v56 = vld [vmem:[%s1294_s6] ss:$0 sm:$0xff] (!%p930_p6) }
  0x1f   : > { %v424_v24 = vrot.slane %v423_v19, 2  ;;  %v440_v25 = vadd.f32 %v439_v20, %v432_v14  ;;  %v487_v14 = vld [vmem:[#allocation2] sm:$0xff] }
  0x20   : > { %v418_v26 = vrot.slane %v417_v22, 2  ;;  %v434_v27 = vadd.f32 %v433_v23, %v431_v17  ;;  %v1039_v20 = vld [vmem:[%s1296_s8] sm:$0xff] (!%p930_p6)   ;;  %v1041_v23 = vld [vmem:[%s1296_s8 + $0x10] sm:$0xff] (!%p930_p6)  }
  0x21   : > { %955 = vmatpush3.bf16.msra.mxu0 %v1024_v6  ;;  %v425_v29 = vadd.f32 %v424_v24, %v423_v19  ;;  %v441_v30 = vrot.slane %v440_v25, 2 }
  0x22   : > { %956 = vmatprep.subr.bf16.mxu0 %v1025_v7  ;;  %v419_v32 = vadd.f32 %v418_v26, %v417_v22  ;;  %v435_v33 = vrot.slane %v434_v27, 2  ;;  %v1040_v22 = vld [vmem:[%s1296_s8 + $0x8] sm:$0xff] (!%p930_p6)  }
  0x23   : > { %v426_v34 = vrot.slane %v425_v29, 1  ;;  %v442_v35 = vadd.f32 %v441_v30, %v440_v25  ;;  %v931_v25 = vld [vmem:[%s1292_s4] ss:$0 sm:$0xff] (!%p930_p6) }
  0x24   : > { %v420_v36 = vrot.slane %v419_v32, 1  ;;  %v436_v37 = vadd.f32 %v435_v33, %v434_v27  ;;  %v1042_v27 = vld [vmem:[%s1296_s8 + $0x18] sm:$0xff] (!%p930_p6)  }
  0x25   : > { %957 = vmatpush3.bf16.msra.mxu0 %v1026_v8  ;;  %v427_v39 = vadd.f32 %v426_v34, %v425_v29  ;;  %v443_v40 = vrot.slane %v442_v35, 1 }
  0x26   : > { %958 = vmatprep.subr.bf16.mxu0 %v1027_v9  ;;  %v421_v41 = vadd.f32 %v420_v36, %v419_v32  ;;  %v437_v42 = vrot.slane %v436_v37, 1  ;;  %v1044_v36 = vld [vmem:[%s1296_s8 + $0x28] sm:$0xff] (!%p930_p6)  }
  0x27   : > { %v430_v43 = vmul.f32 0.125, %v427_v39  ;;  %v444_v44 = vadd.f32 %v443_v40, %v442_v35 }
  0x28   : > { %v429_v45 = vmul.f32 0.125, %v421_v41  ;;  %v438_v46 = vadd.f32 %v437_v42, %v436_v37  ;;  %v1045_v41 = vld [vmem:[%s1296_s8 + $0x30] sm:$0xff] (!%p930_p6)  }
  0x29   : > { %959 = vmatpush3.bf16.msra.mxu0 %v1028_v10  ;;  %v446_v47 = vmul.f32 0.125, %v444_v44  ;;  %v448_v48 = vmul.f32 %v430_v43, %v430_v43  ;;  %v452_v60 = vsub.f32 %v1192_v12, %v430_v43 }
  0x2a   : > { %960 = vmatprep.subr.bf16.mxu0 %v1029_v11  ;;  %v445_v49 = vmul.f32 0.125, %v438_v46  ;;  %v447_v50 = vmul.f32 %v429_v45, %v429_v45  ;;  %v451_v62 = vsub.f32 %v1198_v15, %v429_v45  ;;  %v1046_v46 = vld [vmem:[%s1296_s8 + $0x38] sm:$0xff] (!%p930_p6)  }
  0x2b   : > { %v450_v51 = vsub.f32 %v446_v47, %v448_v48 }
  0x2c   : > { %v449_v53 = vsub.f32 %v445_v49, %v447_v50 }
  0x2d   : > { %961 = vmatpush3.bf16.msra.mxu0 %v1030_v18  ;;  %v454_v54 = vadd.f32 1e-05, %v450_v51 }
  0x2e   : > { %962 = vmatprep.subr.bf16.mxu0 %v1031_v21  ;;  %v453_v55 = vadd.f32 1e-05, %v449_v53  ;;  %v1088_v21 = vmov (!%p930_p6), 0.0   ;;  %v932_v53 = vld [vmem:[%s1293_s5] ss:$0 sm:$0xff] (!%p930_p6) }
  0x2f   : > { %1035 = vrsqrt.f32 %v454_v54  ;;  %v711_v54 = vld [vmem:[%s1295_s7] sm:$0xff] (!%p930_p6) }
  0x30   : > { %1037 = vrsqrt.f32 %v453_v55  ;;  %vm712_vm1 = vcmp.ne.f32.partialorder (!%p930_p6), %v711_v54, 0.0 }
  0x31   : > { %963 = vmatpush3.bf16.msra.mxu0 %v1032_v28  ;;  %vm943_vm2 = vmpackc.low (!%p930_p6), %vm712_vm1, %vm712_vm1 }
  0x32   : > { %964 = vmatprep.subr.bf16.mxu0 %v1033_v31  ;;  %v1043_v31 = vld [vmem:[%s1296_s8 + $0x20] sm:$0xff] (!%p930_p6)  }
  0x35   : > { %965 = vmatpush3.bf16.msra.mxu0 %v1034_v38 }
  0x36   : > { %981 = vmatprep.subr.bf16.mxu0 (!%p930_p6), %v1088_v21 }
  0x39   : > { %v1036_v0 = vpop.eup %1035 }
  0x3a   : > { %v1038_v2 = vpop.eup %1037  ;;  %v458_v3 = vmul.f32 %v1036_v0, %v452_v60  ;;  %v934_v60 = vld [vmem:[%s1297_s9] ss:$0 sm:$0xff] (!%p930_p6) }
  0x3b   : > { %v457_v6 = vmul.f32 %v1038_v2, %v451_v62 }
  0x3c   : > { %v472_v7 = vmul.f32 %v468_v63, %v458_v3 }
  0x3d   : > { %v471_v8 = vmul.f32 %v464_v1, %v457_v6 }
  0x3e   : > { %v486_v9 = vadd.f32 %v482_v4, %v472_v7 }
  0x3f   : > { %v485_v10 = vadd.f32 %v478_v5, %v471_v8 }
  0x40   : > { %v489_v11 = vpack.c.bf16 %v486_v9, %v486_v9 }
  0x41   : > { %v488_v12 = vpack.c.bf16 %v485_v10, %v485_v10 }
  0x42   : > { %650 = vmatprep.mubr.bf16.mxu0 %v489_v11 }
  0x43   : > { %651 = vmatmul.mubr.bf16.vlgmr.msra.gmra.mrb[0].mxu0 %v488_v12 }
  0x44   : > { %982 = vmatpush3.bf16.msra.mxu0 (!%p930_p6), %v1039_v20  ;;  %997 = vmatprep.mubr.msk.bf16.mxu0 (!%p930_p6), %vm1089_vm0, %v1088_v21 }
  0x45   : > { %983 = vmatprep.subr.bf16.mxu0 (!%p930_p6), %v1088_v21 }
  0x48   : > { %984 = vmatpush3.bf16.msra.mxu0 (!%p930_p6), %v1040_v22 }
  0x49   : > { %985 = vmatprep.subr.bf16.mxu0 (!%p930_p6), %v1088_v21 }
  0x4c   : > { %986 = vmatpush3.bf16.msra.mxu0 (!%p930_p6), %v1041_v23 }
  0x4d   : > { %987 = vmatprep.subr.bf16.mxu0 (!%p930_p6), %v1088_v21 }
  0x50   : > { %988 = vmatpush3.bf16.msra.mxu0 (!%p930_p6), %v1042_v27 }
  0x51   : > { %989 = vmatprep.subr.bf16.mxu0 (!%p930_p6), %v1088_v21 }
  0x54   : > { %990 = vmatpush3.bf16.msra.mxu0 (!%p930_p6), %v1043_v31 }
  0x55   : > { %991 = vmatprep.subr.bf16.mxu0 (!%p930_p6), %v1088_v21 }
  0x58   : > { %992 = vmatpush3.bf16.msra.mxu0 (!%p930_p6), %v1044_v36 }
  0x59   : > { %993 = vmatprep.subr.bf16.mxu0 (!%p930_p6), %v1088_v21 }
  0x5c   : > { %994 = vmatpush3.bf16.msra.mxu0 (!%p930_p6), %v1045_v41 }
  0x5d   : > { %995 = vmatprep.subr.bf16.mxu0 (!%p930_p6), %v1088_v21 }
  0x60   : > { %996 = vmatpush3.bf16.msra.mxu0 (!%p930_p6), %v1046_v46 }
 0x116   : > { %v966_v13 = vpop.f32.mrb[0].mxu0  ;;  %663 = sbr.rel (%p930_p6) target bundleno = 550 (0x226), region = 68 }
 0x117   : > { %v967_v16 = vpop.f32.mrb[1].mxu0 }
 0x118   : > { %v968_v15 = vadd.f32 %v967_v16, %v966_v13  ;;  %v969_v17 = vpop.f32.mrb[2].mxu0 }
 0x119   : > { %v970_v18 = vpop.f32.mrb[3].mxu0 }
 0x11a   : > { %v658_v19 = vadd.f32 %v968_v15, %v487_v14 }
 0x11c   : > { %659 = vst [vmem:[#allocation2] sm:$0xff] %v658_v19 }
 0x123   : > { %v664_v24 = vld [vmem:[#allocation2] sm:$0xff] }
 0x124   : > { %v672_v26 = vadd.f32 %v931_v25, %v664_v24 }
 0x126   : > { %v673_v28 = vmax.f32 %v672_v26, 0.0 }
 0x128   : > { %v674_v29 = vrot.slane %v673_v28, 4  ;;  %v681_v30 = vmul.f32 %v673_v28, %v673_v28 }
 0x12a   : > { %v675_v32 = vadd.f32 %v674_v29, %v673_v28  ;;  %v682_v33 = vrot.slane %v681_v30, 4 }
 0x12c   : > { %v676_v34 = vrot.slane %v675_v32, 2  ;;  %v683_v35 = vadd.f32 %v682_v33, %v681_v30 }
 0x12e   : > { %v677_v37 = vadd.f32 %v676_v34, %v675_v32  ;;  %v684_v38 = vrot.slane %v683_v35, 2 }
 0x130   : > { %v678_v39 = vrot.slane %v677_v37, 1  ;;  %v685_v40 = vadd.f32 %v684_v38, %v683_v35 }
 0x132   : > { %v679_v42 = vadd.f32 %v678_v39, %v677_v37  ;;  %v686_v43 = vrot.slane %v685_v40, 1 }
 0x134   : > { %v680_v44 = vmul.f32 0.125, %v679_v42  ;;  %v687_v45 = vadd.f32 %v686_v43, %v685_v40 }
 0x136   : > { %v688_v47 = vmul.f32 0.125, %v687_v45  ;;  %v689_v48 = vmul.f32 %v680_v44, %v680_v44  ;;  %v691_v51 = vsub.f32 %v673_v28, %v680_v44 }
 0x138   : > { %v690_v49 = vsub.f32 %v688_v47, %v689_v48 }
 0x13a   : > { %v692_v50 = vadd.f32 1e-05, %v690_v49 }
 0x13c   : > { %1047 = vrsqrt.f32 %v692_v50 }
 0x146   : > { %v1048_v52 = vpop.eup %1047 }
 0x147   : > { %v694_v55 = vmul.f32 %v1048_v52, %v691_v51 }
 0x149   : > { %v702_v57 = vmul.f32 %v932_v53, %v694_v55 }
 0x14b   : > { %v710_v58 = vadd.f32 %v933_v56, %v702_v57 }
 0x14d   : > { %v944_v59 = vpack.c.bf16 %v710_v58, %v710_v58 }
 0x14f   : > { %998 = vmatmul.mubr.msk.bf16.vlgmr.msra.gmra.mrb[0].mxu0 %vm943_vm2, %v944_v59 }
 0x222   : > { %v820_v61 = vpop.f32.mrb[0].mxu0 }
 0x223   : > { %v821_v62 = vadd.f32 %v934_v60, %v820_v61  ;;  %v999_v63 = vpop.f32.mrb[1].mxu0 }
 0x224   : > { %v823_v0 = vpop.f32.mrb[2].mxu0 }
 0x225   : > { %826 = vst [vmem:[#allocation3] sm:$0xff] %v821_v62  ;;  %v1000_v1 = vpop.f32.mrb[3].mxu0 }
 0x226 PF: > { %p1005_p7 = scmp.eq.s32.totalorder %s1152_s14, 3  ;;  %s1090_s25 = smov [#allocation3]  }
 0x227   : > { %s834_s26 = sshll.u32 %s1090_s25, 4  ;;  %s835_s26 = int_to_ptr.vmem [resolvable:$true] %s834_s26 }
 0x228   : > { %s1049_s27 = scalar_lea.vmem %s835_s26, 128  ;;  %p1056_p11 = scmp.lt.s32.totalorder %s835_s26, %s835_s26 }
 0x229   : > { %p1050_p8 = scmp.ne.s32.totalorder %s835_s26, %s1049_s27  ;;  %p1057_p12 = scmp.lt.s32.totalorder %s1049_s27, %s1049_s27 }
 0x22b   : > { %p1051_p9 = pnand %p1050_p8, %p1005_p7  ;;  %p1058_p13 = por %p1057_p12, %p1056_p11 }
 0x22d   : > { %p1052_p10 = pneg %p1051_p9 }
 0x22f   : > { %p1059_p0 = pnand %p1058_p13, %p1052_p10 }
 0x231   : > { %1062 = shalt.err (!%p1059_p0)
}
 0x232   : > { %s1063_s30 = scalar_lea.hbm %s1298_s10, 128 }
 0x233   : > { %p1064_p1 = scmp.ne.s32.totalorder %s1298_s10, %s1063_s30  ;;  %p1069_p4 = scmp.lt.u32.totalorder %s1063_s30, %s1298_s10 }
 0x235   : > { %p1065_p2 = pnand %p1064_p1, %p1005_p7 }
 0x237   : > { %p1066_p3 = pneg %p1065_p2 }
 0x239   : > { %p1071_p5 = pnand %p1069_p4, %p1066_p3 }
 0x23b   : > { %1074 = shalt.err (!%p1071_p5)
}
 0x23c   : > { %1002 = dma.vmem_to_hbm [thread:$0]  (%p1005_p7), %s835_s26, 128, %s1298_s10, [#allocation4]  }
 0x23d   : > { %1080 = dma.done.wait (%p1005_p7), [#allocation4], 128  }
 0x23e   : > { %1082 = vsyncadd (%p1005_p7), [#allocation4], 4294967168 }
 0x23f PF: > { %s21_s13 = sadd.s32 1, %s1085_s13  }
 0x240   : > { %p18_p6 = scmp.ge.s32.totalorder %s21_s13, 6  }
 0x242   :  { %20 = sbr.rel (!%p18_p6) target bundleno = 1 (0x1), region = 104 }
 0x249   :  { %847 = vsyncpa [#allocation4], 1 }
 0x24a   :  { %849 = vsyncpa [#allocation4 + $0x1], 1 }

</bundles_post_ra>
